<compile_context>
chip_gen: v7x
topology: tpu7x:2x2x1
jax: 0.10.0
libtpu: 0.0.40
codegen_flags: <defaults>
</compile_context>

<pallas_src>
import functools

import jax
import jax.numpy as jnp
from jax.experimental import pallas as pl
from jax.experimental.pallas import tpu as pltpu


def _time2vec_kernel(x_ref, wcat_ref, bcat_ref, wt_ref, bias_ref, o_ref, *,
                     activation, hm1, tb):
    """One grid step: TB independent batch slabs, each (S,F) -> (S,O)."""
    act = jnp.sin if activation == "sin" else jnp.cos
    wt = wt_ref[...]                       # (H, O)  grid-invariant, stays resident
    bias = bias_ref[...]                   # (1, O)
    S, H = bcat_ref.shape[1], bcat_ref.shape[2]

    # Column mask: activation on lanes [0, H-1), identity on the last lane
    # (== the PyTorch concat([v1, v2]) layout).
    col = jax.lax.broadcasted_iota(jnp.int32, (S, H), 1)
    keep = col < hm1

    for bb in range(tb):                   # tb is small & static -> unrolled
        # pre = x @ [w | w0] + [b | b0]    single MXU pass over all H lanes
        pre = (jnp.dot(x_ref[bb], wcat_ref[bb],
                       preferred_element_type=jnp.float32)
               + bcat_ref[bb])             # (S, H) f32
        v3 = jnp.where(keep, act(pre), pre)
        # y = v3 @ fc1.W^T + fc1.bias
        y = jnp.dot(v3, wt, preferred_element_type=jnp.float32) + bias
        o_ref[bb] = y.astype(o_ref.dtype)


def _choose_tb(B, S, F, H, O, itemsize, vmem_budget=8 * 1024 * 1024):
    """Largest divisor of B whose double-buffered tiles fit the budget while
    keeping >= 2 grid steps (so a 2-TC chip can shard the parallel axis)."""
    per_batch = 2 * (S * F + F * H + S * H + S * O) * itemsize
    cap = max(1, vmem_budget // max(per_batch, 1))
    divisors = [d for d in range(1, B + 1) if B % d == 0 and d <= cap]
    if not divisors:
        return 1
    multi = [d for d in divisors if B // d >= 2]
    return max(multi) if multi else max(divisors)


def time2vec_forward(x, w, b, w0, b0, fc_w, fc_b, *, activation="sin", tb=None):
    """x:(B,S,F)  w:(B,F,H-1)  b:(B,S,H-1)  w0:(B,F,1)  b0:(B,S,1)
       fc_w:(O,H)  fc_b:(O,)   ->  (B,S,O)"""
    B, S, F = x.shape
    Hm1 = w.shape[-1]
    H = Hm1 + 1
    O = fc_w.shape[0]

    # Wrapper-side glue (pure layout plumbing, no hot-path compute):
    wcat = jnp.concatenate([w, w0], axis=-1)           # (B, F, H)
    bcat = jnp.concatenate([b, b0], axis=-1)           # (B, S, H)
    wt = jnp.transpose(fc_w)                           # (H, O)
    bias = fc_b.reshape(1, O)                          # (1, O)

    if tb is None:
        tb = _choose_tb(B, S, F, H, O, jnp.dtype(x.dtype).itemsize)
    grid = (pl.cdiv(B, tb),)

    kernel = functools.partial(_time2vec_kernel,
                               activation=activation, hm1=Hm1, tb=tb)

    return pl.pallas_call(
        kernel,
        out_shape=jax.ShapeDtypeStruct((B, S, O), x.dtype),
        grid_spec=pltpu.PrefetchScalarGridSpec(
            num_scalar_prefetch=0,
            grid=grid,
            in_specs=[
                pl.BlockSpec((tb, S, F), lambda i: (i, 0, 0)),   # x
                pl.BlockSpec((tb, F, H), lambda i: (i, 0, 0)),   # [w | w0]
                pl.BlockSpec((tb, S, H), lambda i: (i, 0, 0)),   # [b | b0]
                pl.BlockSpec((H, O),     lambda i: (0, 0)),      # fc1.W^T (resident)
                pl.BlockSpec((1, O),     lambda i: (0, 0)),      # fc1.bias
            ],
            out_specs=pl.BlockSpec((tb, S, O), lambda i: (i, 0, 0)),
        ),
        compiler_params=pltpu.CompilerParams(
            dimension_semantics=("parallel",),
            vmem_limit_bytes=32 * 1024 * 1024,
        ),
    )(x, wcat, bcat, wt, bias)


def _reference(x, w, b, w0, b0, fc_w, fc_b, activation="sin"):
    act = jnp.sin if activation == "sin" else jnp.cos
    v1 = act(jnp.matmul(x, w) + b)
    v2 = jnp.matmul(x, w0) + b0
    v3 = jnp.concatenate([v1, v2], axis=-1)
    return jnp.matmul(v3, fc_w.T) + fc_b


if __name__ == "__main__":
    # Small shapes consistent with the module's forward:
    #   x: (batch_size, sentence_len, in_features)
    batch_size, sentence_len, in_features = 2, 8, 16
    hidden_dim, out_features_end = 32, 16

    key = jax.random.PRNGKey(0)
    kx, kw, kb, kw0, kb0, kfw, kfb = jax.random.split(key, 7)

    # Deterministic synthetic parameters (module inits to zeros; small random
    # values here so the kernel exercises a non-trivial path).
    x    = jax.random.normal(kx,  (batch_size, sentence_len, in_features), jnp.float32)
    w    = jax.random.normal(kw,  (batch_size, in_features, hidden_dim - 1), jnp.float32) * 0.1
    b    = jax.random.normal(kb,  (batch_size, sentence_len, hidden_dim - 1), jnp.float32) * 0.1
    w0   = jax.random.normal(kw0, (batch_size, in_features, 1), jnp.float32) * 0.1
    b0   = jax.random.normal(kb0, (batch_size, sentence_len, 1), jnp.float32) * 0.1
    fc_w = jax.random.normal(kfw, (out_features_end, hidden_dim), jnp.float32) * 0.1
    fc_b = jax.random.normal(kfb, (out_features_end,), jnp.float32) * 0.1

    out = time2vec_forward(x, w, b, w0, b0, fc_w, fc_b, activation="sin")
    out = jax.block_until_ready(out)

    ref = _reference(x, w, b, w0, b0, fc_w, fc_b, activation="sin")
    assert out.shape == (batch_size, sentence_len, out_features_end)
    assert jnp.allclose(out, ref, atol=1e-5, rtol=1e-5), "mismatch vs reference"

    print("KERNEL_OK")
</pallas_src>

<mosaic_0001>
module attributes {stable_mosaic.version = 11 : i64} {
  func.func @_time2vec_kernel(%arg0: i32, %arg1: memref<1x8x16xf32, #tpu.memory_space<vmem>>, %arg2: memref<1x16x32xf32, #tpu.memory_space<vmem>>, %arg3: memref<1x8x32xf32, #tpu.memory_space<vmem>>, %arg4: memref<32x16xf32, #tpu.memory_space<vmem>>, %arg5: memref<1x16xf32, #tpu.memory_space<vmem>>, %arg6: memref<1x8x16xf32, #tpu.memory_space<vmem>>) attributes {dimension_semantics = [#tpu.dimension_semantics<parallel>], iteration_bounds = array<i64: 2>, scalar_prefetch = 0 : i64, scratch_operands = 0 : i64, tpu.core_type = #tpu.core_type<tc>, window_params = [{transform_indices = @transform_0, window_bounds = array<i64: 1, 8, 16>}, {transform_indices = @transform_1, window_bounds = array<i64: 1, 16, 32>}, {transform_indices = @transform_2, window_bounds = array<i64: 1, 8, 32>}, {pipeline_mode = #tpu.pipeline_mode<synchronous>, transform_indices = @transform_3, window_bounds = array<i64: 32, 16>}, {pipeline_mode = #tpu.pipeline_mode<synchronous>, transform_indices = @transform_4, window_bounds = array<i64: 1, 16>}, {transform_indices = @transform_5, window_bounds = array<i64: 1, 8, 16>}]} {
    %c0 = arith.constant 0 : index
    %c0_0 = arith.constant 0 : index
    %0 = vector.load %arg4[%c0, %c0_0] : memref<32x16xf32, #tpu.memory_space<vmem>>, vector<32x16xf32>
    %c0_1 = arith.constant 0 : index
    %c0_2 = arith.constant 0 : index
    %1 = vector.load %arg5[%c0_1, %c0_2] : memref<1x16xf32, #tpu.memory_space<vmem>>, vector<1x16xf32>
    %2 = tpu.iota {dimensions = array<i32: 1>} : vector<8x32xi32>
    %c31_i32 = arith.constant 31 : i32
    %3 = vector.broadcast %c31_i32 : i32 to vector<8x32xi32>
    %4 = arith.cmpi slt, %2, %3 : vector<8x32xi32>
    %c0_3 = arith.constant 0 : index
    %c0_4 = arith.constant 0 : index
    %c0_5 = arith.constant 0 : index
    %5 = vector.load %arg1[%c0_3, %c0_4, %c0_5] : memref<1x8x16xf32, #tpu.memory_space<vmem>>, vector<1x8x16xf32>
    %6 = vector.shape_cast %5 : vector<1x8x16xf32> to vector<8x16xf32>
    %c0_6 = arith.constant 0 : index
    %c0_7 = arith.constant 0 : index
    %c0_8 = arith.constant 0 : index
    %7 = vector.load %arg2[%c0_6, %c0_7, %c0_8] : memref<1x16x32xf32, #tpu.memory_space<vmem>>, vector<1x16x32xf32>
    %8 = vector.shape_cast %7 : vector<1x16x32xf32> to vector<16x32xf32>
    %cst = arith.constant dense<0.000000e+00> : vector<8x32xf32>
    %9 = tpu.matmul %6, %8, %cst {dimension_numbers = #tpu.dot_dimension_numbers<[1], [0], [0], [1], [0, 0, 1, 1], [], []>} : vector<8x16xf32>, vector<16x32xf32>, vector<8x32xf32> -> vector<8x32xf32>
    %c0_9 = arith.constant 0 : index
    %c0_10 = arith.constant 0 : index
    %c0_11 = arith.constant 0 : index
    %10 = vector.load %arg3[%c0_9, %c0_10, %c0_11] : memref<1x8x32xf32, #tpu.memory_space<vmem>>, vector<1x8x32xf32>
    %11 = vector.shape_cast %10 : vector<1x8x32xf32> to vector<8x32xf32>
    %12 = arith.addf %9, %11 : vector<8x32xf32>
    %13 = math.sin %12 : vector<8x32xf32>
    %14 = arith.select %4, %13, %12 : vector<8x32xi1>, vector<8x32xf32>
    %cst_12 = arith.constant dense<0.000000e+00> : vector<8x16xf32>
    %15 = tpu.matmul %14, %0, %cst_12 {dimension_numbers = #tpu.dot_dimension_numbers<[1], [0], [0], [1], [0, 0, 1, 1], [], []>} : vector<8x32xf32>, vector<32x16xf32>, vector<8x16xf32> -> vector<8x16xf32>
    %16 = vector.broadcast %1 : vector<1x16xf32> to vector<8x16xf32>
    %17 = arith.addf %15, %16 : vector<8x16xf32>
    %c0_13 = arith.constant 0 : index
    %c0_14 = arith.constant 0 : index
    %c0_15 = arith.constant 0 : index
    %18 = vector.load %arg6[%c0_13, %c0_14, %c0_15] : memref<1x8x16xf32, #tpu.memory_space<vmem>>, vector<1x8x16xf32>
    %19 = vector.shape_cast %18 : vector<1x8x16xf32> to vector<8x16xf32>
    %20 = vector.shape_cast %17 : vector<8x16xf32> to vector<1x8x16xf32>
    tpu.vector_store %arg6[%c0_13, %c0_14, %c0_15], %20 {strides = array<i32>} : memref<1x8x16xf32, #tpu.memory_space<vmem>>, vector<1x8x16xf32>,
    return
  }
  func.func @transform_0(%arg0: i32) -> (i32, i32, i32) {
    %c0_i32 = arith.constant 0 : i32
    %c0_i32_0 = arith.constant 0 : i32
    %c0_i32_1 = arith.constant 0 : i32
    return %arg0, %c0_i32, %c0_i32_0 : i32, i32, i32
  }
  func.func @transform_1(%arg0: i32) -> (i32, i32, i32) {
    %c0_i32 = arith.constant 0 : i32
    %c0_i32_0 = arith.constant 0 : i32
    %c0_i32_1 = arith.constant 0 : i32
    return %arg0, %c0_i32, %c0_i32_0 : i32, i32, i32
  }
  func.func @transform_2(%arg0: i32) -> (i32, i32, i32) {
    %c0_i32 = arith.constant 0 : i32
    %c0_i32_0 = arith.constant 0 : i32
    %c0_i32_1 = arith.constant 0 : i32
    return %arg0, %c0_i32, %c0_i32_0 : i32, i32, i32
  }
  func.func @transform_3(%arg0: i32) -> (i32, i32) {
    %c0_i32 = arith.constant 0 : i32
    %c0_i32_0 = arith.constant 0 : i32
    %c0_i32_1 = arith.constant 0 : i32
    return %c0_i32, %c0_i32_0 : i32, i32
  }
  func.func @transform_4(%arg0: i32) -> (i32, i32) {
    %c0_i32 = arith.constant 0 : i32
    %c0_i32_0 = arith.constant 0 : i32
    %c0_i32_1 = arith.constant 0 : i32
    return %c0_i32, %c0_i32_0 : i32, i32
  }
  func.func @transform_5(%arg0: i32) -> (i32, i32, i32) {
    %c0_i32 = arith.constant 0 : i32
    %c0_i32_0 = arith.constant 0 : i32
    %c0_i32_1 = arith.constant 0 : i32
    return %arg0, %c0_i32, %c0_i32_0 : i32, i32, i32
  }
}

</mosaic_0001>

<bundles_post_ra>
// kernel: tpu_custom_call.1
= control target key start
LH: loop header
LB: loop body
LE: loop exit
PB: predicated region body
PF: predicated region fallthrough
CT: control target
= control target key end

     0   :  { %10 = vsyncpa [#allocation3], 0  ;;  %s1132_s0 = inlined_call_operand.vmem [shape: f32[2,8,16], index: 0, kind: input, shape index: {}]   ;;  %s1133_s1 = inlined_call_operand.vmem [shape: f32[2,16,32], index: 1, kind: input, shape index: {}]   ;;  %s1134_s2 = inlined_call_operand.hbm [shape: f32[2,8,32], index: 2, kind: input, shape index: {}]   ;;  %s1135_s3 = inlined_call_operand.vmem [shape: f32[32,16], index: 3, kind: input, shape index: {}]   ;;  %s1136_s4 = inlined_call_operand.vmem [shape: f32[1,16], index: 4, kind: input, shape index: {}]   ;;  %s1137_s5 = inlined_call_operand.hbm [shape: f32[2,8,16], index: 5, kind: output, shape index: {}]  }
   0x1   :  { %12 = vsyncpa [#allocation3 + $0x1], 0 }
   0x2   :  { %13 = vsyncpa [#allocation4], 0 }
   0x3   :  { %15 = vsyncpa [#allocation4 + $0x1], 0  ;;  %s917_s18 = smov 0   ;;  %s919_s19 = smov 0  }
   0x4   :  { %s921_s20 = smov 0   ;;  %s923_s21 = smov 0  }
   0x5 LB: > { %s938_s22 = sadd.s32 4294967295, %s874_s21   ;;  %s657_s23 = sadd.s32 4294967294, %s874_s21   ;;  %s874_s21 = sphi %s923_s21, %s1152_s21   ;;  %s870_s20 = sphi %s921_s20, %s1151_s20   ;;  %s866_s19 = sphi %s919_s19, %s1150_s19   ;;  %s862_s18 = sphi %s917_s18, %s1149_s18  }
   0x6   : > { %s942_s24 = sadd.s32 1, %s874_s21   ;;  %s80_s25 = sadd.s32 1, %s870_s20 }
   0x7   : > { %s77_s26 = ssub.s32 %s874_s21, %s942_s24  ;;  %p87_p0 = scmp.ne.s32.totalorder %s870_s20, %s866_s19 }
   0x8   : > { %p78_p1 = scmp.eq.s32.totalorder %s77_s26, 0  ;;  %p88_p2 = scmp.eq.s32.totalorder %s874_s21, 0 }
   0x9   : > { %p93_p3 = scmp.ne.s32.totalorder %s866_s19, %s862_s18  ;;  %p94_p4 = scmp.eq.s32.totalorder %s938_s22, 0 }
   0xa   : > { %s954_s27 = scalar_select %p78_p1, %s870_s20, %s80_s25  }
   0xb   : > { %p956_p5 = por %p88_p2, %p87_p0  ;;  %p960_p6 = por %p94_p4, %p93_p3 }
   0xc   : > { %p159_p7 = scmp.eq.s32.totalorder %s938_s22, 1  ;;  %p165_p8 = scmp.eq.s32.totalorder %s657_s23, 1 }
   0xd   : > { %p731_p10 = scmp.lt.s32.totalorder %s874_s21, 2  ;;  %s206_s7 = sand.u32 1, %s870_s20  }
   0xe   : > { %p967_p11 = por %p159_p7, %p87_p0  ;;  %p971_p12 = por %p165_p8, %p93_p3 }
   0xf   : > { %s661_s8 = sshll.u32 %s874_s21, 7  ;;  %s660_s9 = sshll.u32 %s206_s7, 3 }
  0x10   : > { %s1141_s30 = scalar_select %p967_p11, 1, 0 }
  0x11   : > { %s1142_s6 = scalar_select %p971_p12, 1, 0 }
  0x12   : > { %s980_s12 = scalar_lea.hbm %s1134_s2, %s661_s8  ;;  %s210_s13 = scalar_lea.vmem [#allocation2], %s660_s9 }
  0x13   : > { %s217_s14 = sshll.u32 %s210_s13, 4  ;;  %p984_p13 = pnand %p731_p10, %p956_p5  ;;  %s988_s14 = int_to_ptr.vmem [resolvable:$true] %s217_s14 }
  0x14   : > { %s207_s16 = scalar_lea.sflag [#allocation3], %s206_s7  ;;  %s778_s17 = scalar_lea.hbm %s980_s12, 128 }
  0x15   : > { %p779_p2 = scmp.ne.s32.totalorder %s980_s12, %s778_s17  ;;  %p780_p3 = pneg %p984_p13 }
  0x16   : > { %s783_s26 = scalar_lea.hbm %s1134_s2, 256  ;;  %p784_p5 = scmp.lt.u32.totalorder %s980_s12, %s1134_s2 }
  0x17   : > { %p781_p4 = pnand %p780_p3, %p779_p2  ;;  %p785_p8 = scmp.lt.u32.totalorder %s783_s26, %s778_s17 }
  0x18   : > { %p787_p9 = scmp.lt.u32.totalorder %s778_s17, %s980_s12 }
  0x19   : > { %p782_p7 = pneg %p781_p4  ;;  %p786_p10 = por %p785_p8, %p784_p5 }
  0x1b   : > { %p788_p0 = por %p787_p9, %p786_p10 }
  0x1d   : > { %p789_p1 = pnand %p788_p0, %p782_p7 }
  0x1f   : > { %792 = shalt.err (!%p789_p1)
}
  0x20   : > { %s793_s7 = scalar_lea.vmem %s988_s14, 128  ;;  %s876_s9 = smov [#allocation2]  }
  0x21   : > { %p794_p2 = scmp.ne.s32.totalorder %s988_s14, %s793_s7  ;;  %s798_s10 = sshll.u32 %s876_s9, 4  ;;  %s799_s10 = int_to_ptr.vmem [resolvable:$false] %s798_s10 }
  0x22   : > { %s800_s11 = scalar_lea.vmem %s799_s10, 256  ;;  %p801_p11 = scmp.lt.s32.totalorder %s988_s14, %s799_s10 }
  0x23   : > { %p796_p4 = pnand %p794_p2, %p780_p3  ;;  %p802_p5 = scmp.lt.s32.totalorder %s800_s11, %s793_s7 }
  0x25   : > { %p797_p12 = pneg %p796_p4  ;;  %p803_p8 = por %p802_p5, %p801_p11 }
  0x27   : > { %p804_p9 = pnand %p803_p8, %p797_p12 }
  0x29   : > { %807 = shalt.err (!%p804_p9)
}
  0x2a   : > { %726 = dma.hbm_to_vmem [thread:$0]  (!%p984_p13), %s980_s12, 128, %s988_s14, %s207_s16  }
  0x2b   : > { %p1144_p0 = scmp.lt.s32.totalorder %s874_s21, 3  ;;  %p1145_p1 = scmp.ge.s32.totalorder %s874_s21, 1 }
  0x2d   : > { %p223_p3 = pnand %p1145_p1, %p1144_p0 }
  0x2e   : > { %s1022_s13 = sand.u32 (!%p223_p3), 1, %s866_s19  }
  0x2f   : > { %226 = sbr.rel (%p223_p3) target bundleno = 589 (0x24d), region = 40  ;;  %s663_s17 = sshll.u32 (!%p223_p3), %s1022_s13, 3 }
  0x30   : > { %s229_s23 = scalar_lea.sflag (!%p223_p3), [#allocation3], %s1022_s13  ;;  %s1028_s15 = scalar_lea.vmem (!%p223_p3), [#allocation2], %s663_s17 }
  0x36   : > { %853 = dma.done.wait (%p960_p6), %s229_s23, 128  }
  0x37   : > { %855 = vsyncadd (%p960_p6), %s229_s23, 4294967168  ;;  %p268_p11 = scmp.lt.s32.totalorder %s938_s22, 1  ;;  %v877_v0 = vmov 0.0|0.0   ;;  %vm878_vm0 = vmmov 0   ;;  %v879_v1 = vmov 0.0   ;;  %vm289_vm1 = vcmask 130048  }
  0x38   : > { %706 = vmatprep.subr.bf16.mxu0 %v877_v0  ;;  %692 = vmatprep.mubr.msk.f32.mxu0 %vm878_vm0, %v879_v1  ;;  %v277_v6 = vld [vmem:[%s1135_s3] sm:$0xff]  ;;  %v278_v7 = vld [vmem:[%s1135_s3 + $0x8] sm:$0xff]  ;;  %v279_v8 = vld [vmem:[%s1135_s3 + $0x10] sm:$0xff]  ;;  %v880_v27 = vmov 2102212464   ;;  %s267_s29 = scalar_lea.vmem [#allocation5], %s663_s17 }
  0x39   : > { %s269_s12 = scalar_select %p268_p11, %s938_s22, 1  ;;  %709 = vmatprep.subr.bf16.mxu1 %v877_v0  ;;  %703 = vmatprep.mubr.msk.f32.mxu1 %vm878_vm0, %v879_v1  ;;  %v710_v9 = vpack.c.bf16 %v278_v7, %v277_v6  ;;  %v280_v10 = vld [vmem:[%s1135_s3 + $0x18] sm:$0xff]  ;;  %v288_v12 = vld [vmem:[%s1028_s15] sm:$0xff]  ;;  %v881_v29 = vmov 920167782   ;;  %vm474_vm0 = vcmask 261120  }
  0x3a   : > { %v713_v11 = vpack.c.bf16 %v280_v10, %v279_v8  ;;  %v882_v33 = vmov 1326507024   ;;  %v883_v35 = vmov 683565275   ;;  %v884_v37 = vmov 2475754826  }
  0x3b   : > { %s679_s14 = sshll.u32 %s269_s12, 4  ;;  %s665_s16 = sshll.u32 %s269_s12, 3  ;;  %711 = vmatpush3.bf16.msra.mxu1 %v710_v9  ;;  %v885_v40 = vmov 2131351028  }
  0x3c   : > { %s276_s28 = scalar_lea.vmem %s1133_s1, %s679_s14  ;;  %s271_s7 = scalar_lea.vmem %s1132_s0, %s665_s16  ;;  %712 = vmatprep.subr.bf16.mxu1 %v877_v0 }
  0x3d   : > { %v286_v2 = vld [vmem:[%s276_s28] sm:$0xff]  ;;  %v287_v3 = vld [vmem:[%s276_s28 + $0x8] sm:$0xff]  ;;  %s676_s28 = sshll.u32 %s938_s22, 7  ;;  %s563_s8 = sshll.u32 %s267_s29, 4  ;;  %s1089_s8 = int_to_ptr.vmem [resolvable:$true] %s563_s8 }
  0x3e   : > { %v707_v4 = vpack.c.bf16 %v287_v3, %v286_v2  ;;  %v285_v5 = vld [vmem:[%s271_s7] sm:$0xff]  ;;  %s1087_s10 = scalar_lea.hbm %s1137_s5, %s676_s28  ;;  %s550_s11 = scalar_lea.sflag [#allocation4], %s1022_s13 }
  0x3f   : > { %714 = vmatpush3.bf16.msra.mxu1 %v713_v11  ;;  %s808_s22 = scalar_lea.vmem %s1089_s8, 128  ;;  %p1146_p12 = scmp.ne.s32.totalorder %s1141_s30, 0 }
  0x40   : > { %708 = vmatpush3.bf16.msra.mxu0 %v707_v4  ;;  %p809_p6 = scmp.ne.s32.totalorder %s1089_s8, %s808_s22  ;;  %s886_s17 = smov [#allocation5]  }
  0x41   : > { %s812_s23 = sshll.u32 %s886_s17, 4  ;;  %s813_s23 = int_to_ptr.vmem [resolvable:$false] %s812_s23 }
  0x42   : > { %p810_p13 = pnand %p809_p6, %p1146_p12  ;;  %s814_s12 = scalar_lea.vmem %s813_s23, 256 }
  0x43   : > { %693 = vmatmul.mubr.msk.f32.vlgmr.msra.gmra.mrb[0].mxu0 %vm289_vm1, %v285_v5  ;;  %p815_p10 = scmp.lt.s32.totalorder %s1089_s8, %s813_s23  ;;  %p816_p2 = scmp.lt.s32.totalorder %s814_s12, %s808_s22 }
  0x44   : > { %p811_p7 = pneg %p810_p13 }
  0x45   : > { %p817_p4 = por %p816_p2, %p815_p10 }
  0x47   : > { %p818_p5 = pnand %p817_p4, %p811_p7 }
 0x116   : > { %v359_v13 = vpop.f32.mrb[0].mxu0 }
 0x117   : > { %v1056_v14 = vadd.f32 %v359_v13, %v288_v12  ;;  %v694_v15 = vpop.f32.mrb[1].mxu0 }
 0x119   : > { %v366_v16 = vand.u32 2139095040, %v1056_v14  ;;  %v363_v17 = vand.u32 2147483647, %v1056_v14  ;;  %vm365_vm9 = vcmp.lt.s32.totalorder %v1056_v14, 0  ;;  %vm455_vm15 = vweird.f32 %v1056_v14 }
 0x11b   : > { %v367_v18 = vshrl.u32 %v366_v16, 23  ;;  %v370_v20 = vand.u32 8388607, %v363_v17  ;;  %vm364_vm10 = vcmp.le.f32.partialorder %v363_v17, 0.7853982 }
 0x11d   : > { %v669_v19 = vadd.s32 4294967169, %v367_v18  ;;  %v371_v23 = vor.u32 8388608, %v370_v20 }
 0x11f   : > { %v373_v21 = vadd.s32 1, %v669_v19  ;;  %v411_v31 = vshll.u32 %v371_v23, 8 }
 0x121   : > { %vm374_vm2 = vcmp.gt.s32.totalorder %v373_v21, 0 }
 0x122   : > { %v375_v22 = vsel %vm374_vm2, %v373_v21, 0 }
 0x123   : > { %v377_v24 = vand.u32 31, %v375_v22  ;;  %v376_v25 = vshrl.u32 %v375_v22, 5 }
 0x125   : > { %v378_v26 = vsub.s32 32, %v377_v24  ;;  %v389_v28 = vshll.u32 %v880_v27, %v377_v24  ;;  %v392_v30 = vshll.u32 %v881_v29, %v377_v24  ;;  %v380_v36 = vshll.u32 %v883_v35, %v377_v24 }
 0x126   : > { %v383_v39 = vshll.u32 %v884_v37, %v377_v24  ;;  %v386_v42 = vshll.u32 %v885_v40, %v377_v24  ;;  %vm398_vm3 = vcmp.lt.s32.totalorder %v376_v25, 4  ;;  %vm395_vm4 = vcmp.lt.s32.totalorder %v376_v25, 1 }
 0x127   : > { %v390_v32 = vshrl.u32 %v881_v29, %v378_v26  ;;  %v393_v34 = vshrl.u32 %v882_v33, %v378_v26  ;;  %v381_v38 = vshrl.u32 %v884_v37, %v378_v26  ;;  %v384_v41 = vshrl.u32 %v885_v40, %v378_v26 }
 0x128   : > { %v387_v43 = vshrl.u32 %v880_v27, %v378_v26  ;;  %v379_v47 = vshrl.u32 %v883_v35, %v378_v26  ;;  %vm396_vm5 = vcmp.lt.s32.totalorder %v376_v25, 2  ;;  %vm397_vm6 = vcmp.lt.s32.totalorder %v376_v25, 3 }
 0x129   : > { %v391_v44 = vor.u32 %v390_v32, %v389_v28  ;;  %v394_v45 = vor.u32 %v393_v34, %v392_v30  ;;  %v382_v46 = vor.u32 %v381_v38, %v380_v36  ;;  %v385_v48 = vor.u32 %v384_v41, %v383_v39 }
 0x12a   : > { %v388_v49 = vor.u32 %v387_v43, %v386_v42  ;;  %v282_v36 = vlaneseq }
 0x12b   : > { %v404_v50 = vsel %vm398_vm3, %v391_v44, 920167782  ;;  %v408_v51 = vsel %vm398_vm3, %v394_v45, 1326507024  ;;  %v403_v53 = vsel %vm395_vm4, %v382_v46, %v385_v48  ;;  %v399_v56 = vsel %vm395_vm4, %v379_v47, %v382_v46  ;;  %v673_v47 = vld [vmem:[%s1136_s4] ss:$0 sm:$0xff] }
 0x12c   : > { %v400_v52 = vsel %vm398_vm3, %v388_v49, 2102212464  ;;  %v405_v54 = vsel %vm397_vm6, %v388_v49, %v404_v50  ;;  %v407_v55 = vsel %vm395_vm4, %v385_v48, %v388_v49  ;;  %v409_v59 = vsel %vm397_vm6, %v391_v44, %v408_v51 }
 0x12d   : > { %v401_v57 = vsel %vm397_vm6, %v385_v48, %v400_v52  ;;  %v406_v58 = vsel %vm396_vm5, %v403_v53, %v405_v54  ;;  %v410_v60 = vsel %vm396_vm5, %v407_v55, %v409_v59  ;;  %v283_v39 = vand.u32 127, %v282_v36 }
 0x12e   : > { %v1062_v61 = vmul.u32.u64.low %v411_v31, %v406_v58  ;;  %v1063_v62 = vmul.u32.u64.high %v411_v31, %v406_v58, %v1062_v61  ;;  %v1065_v63 = vmul.u32.u64.low %v411_v31, %v410_v60  ;;  %v1066_v0 = vmul.u32.u64.high %v411_v31, %v410_v60, %v1065_v63 }
 0x12f   : > { %v402_v1 = vsel %vm396_vm5, %v399_v56, %v401_v57  ;;  %vm284_vm13 = vcmp.lt.s32.totalorder %v283_v39, 31 }
 0x130   : > { %v421_v2 = vadd.s32 1, %v1063_v62  ;;  %v418_v3 = vmul.u32 %v411_v31, %v402_v1  ;;  %vm420_vm7 = vc.u32 %v1066_v0, %v1062_v61  ;;  %v419_v16 = vadd.s32 %v1062_v61, %v1066_v0 }
 0x132   : > { %v422_v4 = vsel %vm420_vm7, %v421_v2, %v1063_v62 }
 0x133   : > { %v423_v5 = vadd.s32 %v422_v4, %v418_v3 }
 0x135   : > { %v424_v6 = vadd.s32 536870912, %v423_v5 }
 0x137   : > { %v425_v7 = vshrl.u32 %v424_v6, 30 }
 0x139   : > { %v426_v8 = vshll.u32 %v425_v7, 30  ;;  %v449_v29 = vsub.s32 4, %v425_v7 }
 0x13b   : > { %v427_v9 = vsub.s32 %v423_v5, %v426_v8  ;;  %v450_v32 = vsel %vm365_vm9, %v449_v29, %v425_v7 }
 0x13c   : > { %v452_v34 = vsel %vm364_vm10, 0, %v450_v32 }
 0x13d   : > { %v429_v10 = vsub.s32 0, %v427_v9  ;;  %v456_v35 = vadd.s32 3, %v452_v34 }
 0x13f   : > { %v670_v11 = vmin.u32 %v429_v10, %v427_v9  ;;  %v457_v37 = vand.u32 3, %v456_v35 }
 0x141   : > { %v431_v12 = vclz %v670_v11  ;;  %vm462_vm11 = vcmp.eq.s32.totalorder %v457_v37, 2  ;;  %vm459_vm12 = vcmp.eq.s32.totalorder %v457_v37, 0  ;;  %vm458_vm14 = vcmp.lt.s32.totalorder %v457_v37, 2 }
 0x143   : > { %v671_v13 = vadd.s32 4294967294, %v431_v12 }
 0x145   : > { %vm672_vm8 = vcmp.lt.s32.totalorder %v671_v13, 0 }
 0x146   : > { %v434_v15 = vsel %vm672_vm8, 0, %v671_v13 }
 0x147   : > { %v435_v18 = vsub.s32 32, %v434_v15  ;;  %v439_v19 = vsub.s32 4294967266, %v434_v15  ;;  %v436_v20 = vshll.u32 %v427_v9, %v434_v15 }
 0x149   : > { %v437_v21 = vshrl.u32 %v419_v16, %v435_v18  ;;  %v440_v22 = vadd.s32 127, %v439_v19 }
 0x14b   : > { %v438_v23 = vor.u32 %v437_v21, %v436_v20  ;;  %v441_v24 = vshll.u32 %v440_v22, 23 }
 0x14d   : > { %v442_v25 = vor.u32 4788187, %v441_v24  ;;  %v445_v27 = vcvt.s32.f32 %v438_v23 }
 0x14f   : > { %v443_v26 = vand.u32 2147483647, %v442_v25 }
 0x151   : > { %v446_v28 = vmul.f32 %v445_v27, %v443_v26 }
 0x153   : > { %v447_v30 = vxor.u32 2147483648, %v446_v28 }
 0x155   : > { %v448_v31 = vsel %vm365_vm9, %v447_v30, %v446_v28 }
 0x156   : > { %v451_v33 = vsel %vm364_vm10, %v1056_v14, %v448_v31 }
 0x157   : > { %774 = vcosq.f32 %v451_v33 }
 0x158   : > { %776 = vsinq.f32 %v451_v33 }
 0x161   : > { %v775_v38 = vpop.eup %774 }
 0x162   : > { %v777_v40 = vpop.eup %776  ;;  %v463_v41 = vxor.u32 2147483648, %v775_v38 }
 0x163   : > { %v460_v42 = vxor.u32 2147483648, %v777_v40 }
 0x164   : > { %v464_v17 = vsel %vm462_vm11, %v463_v41, %v777_v40 }
 0x165   : > { %v461_v43 = vsel %vm459_vm12, %v775_v38, %v460_v42 }
 0x166   : > { %v465_v44 = vsel %vm458_vm14, %v461_v43, %v464_v17 }
 0x167   : > { %v466_v45 = vsel %vm455_vm15, nan, %v465_v44 }
 0x168   : > { %v467_v46 = vsel %vm284_vm13, %v466_v45, %v1056_v14 }
 0x169   : > { %704 = vmatmul.mubr.msk.f32.vlgmr.msra.gmra.mrb[0].mxu1 %vm474_vm0, %v467_v46 }
 0x23c   : > { %v544_v48 = vpop.f32.mrb[0].mxu1 }
 0x23d   : > { %v545_v49 = vadd.f32 %v673_v47, %v544_v48  ;;  %v705_v50 = vpop.f32.mrb[1].mxu1 }
 0x23f   : > { %548 = vst.msk [vmem:[%s267_s29] sm:$0xff] %vm289_vm1, %v545_v49 }
 0x240   : > { %821 = shalt.err (!%p818_p5)
}
 0x241   : > { %s822_s13 = scalar_lea.hbm %s1087_s10, 128  ;;  %s826_s25 = scalar_lea.hbm %s1137_s5, 256 }
 0x242   : > { %p823_p8 = scmp.ne.s32.totalorder %s1087_s10, %s822_s13  ;;  %p827_p1 = scmp.lt.u32.totalorder %s1087_s10, %s1137_s5 }
 0x243   : > { %p828_p3 = scmp.lt.u32.totalorder %s826_s25, %s822_s13  ;;  %p830_p6 = scmp.lt.u32.totalorder %s822_s13, %s1087_s10 }
 0x244   : > { %p824_p9 = pnand %p823_p8, %p1146_p12 }
 0x245   : > { %p829_p11 = por %p828_p3, %p827_p1 }
 0x246   : > { %p825_p0 = pneg %p824_p9 }
 0x247   : > { %p831_p13 = por %p830_p6, %p829_p11 }
 0x249   : > { %p832_p7 = pnand %p831_p13, %p825_p0 }
 0x24b   : > { %835 = shalt.err (!%p832_p7)
}
 0x24c   : > { %721 = dma.vmem_to_hbm [thread:$0]  (%p1146_p12), %s1089_s8, 128, %s1087_s10, %s550_s11  }
 0x24d PF: > { %s575_s28 = sand.u32 1, %s862_s18   ;;  %p1147_p10 = scmp.ne.s32.totalorder %s1142_s6, 0 }
 0x24e   : > { %p1148_p2 = scmp.ge.s32.totalorder %s874_s21, 2  ;;  %s576_s29 = scalar_lea.sflag [#allocation4], %s575_s28 }
 0x250   : > { %p728_p4 = pnand %p1148_p2, %p1147_p10 }
 0x252   : > { %857 = dma.done.wait (!%p728_p4), %s576_s29, 128  }
 0x253   : > { %859 = vsyncadd (!%p728_p4), %s576_s29, 4294967168  ;;  %p18_p5 = scmp.ge.s32.totalorder %s942_s24, 4   ;;  %s1149_s18 = smov %s866_s19 }
 0x254   : > { %s1150_s19 = smov %s870_s20  ;;  %s1151_s20 = smov %s954_s27 }
 0x255   : > { %s1152_s21 = smov %s942_s24  ;;  %20 = sbr.rel (!%p18_p5) target bundleno = 5 (0x5), region = 91 }
 0x25c   :  { %581 = vsyncpa [#allocation3], 1 }
 0x25d   :  { %583 = vsyncpa [#allocation3 + $0x1], 1 }
 0x25e   :  { %584 = vsyncpa [#allocation4], 1 }
 0x25f   :  { %586 = vsyncpa [#allocation4 + $0x1], 1 }

</bundles_post_ra>
